<compile_context>
chip_gen: v6e
topology: v6e:2x2x1
jax: 0.10.0
libtpu: 0.0.40
codegen_flags: <defaults>
</compile_context>

<pallas_src>
import math
from functools import partial

import jax
import jax.numpy as jnp
from jax.experimental import pallas as pl
from jax.experimental.pallas import tpu as pltpu


def _inception_attention_kernel(y_ref, pw_ref, pb_ref, lw_ref, lb_ref, o_ref,
                                *, patch_info, w_size):
    """One grid step processes a (bc_tile, W) slab through every patch branch.

    y_ref  : (bc_tile, W)        input slab, rows = (b*c), lanes = (w*p)
    pw_ref : (W, 2*n*W)          block-diag fused Q/K weights for all branches
    pb_ref : (1, 2*n*W)          fused Q/K biases
    lw_ref : (S, W)              scatter-linear: attention-map -> averaged output
    lb_ref : (1, W)              averaged output bias
    o_ref  : (bc_tile, W)        averaged result (same layout as y)
    """
    W = w_size
    y = y_ref[...].astype(jnp.float32)                                   # (bc, W)

    # Single MXU matmul: Q and K projections of every branch at once.
    proj = jnp.dot(y, pw_ref[...], preferred_element_type=jnp.float32) + pb_ref[...]

    a_parts = []
    for br, (w, p) in enumerate(patch_info):
        scale = 1.0 / math.sqrt(p)
        qoff = 2 * W * br
        koff = qoff + W
        for i in range(w):
            qi = proj[:, qoff + i * p: qoff + (i + 1) * p]               # (bc, p)
            cols = []
            for j in range(w):
                kj = proj[:, koff + j * p: koff + (j + 1) * p]           # (bc, p)
                # VPU multiply + XLU lane reduce; MXU not involved.
                cols.append(jnp.sum(qi * kj, axis=-1, keepdims=True))
            s_i = jnp.concatenate(cols, axis=-1) * scale                 # (bc, w)
            s_i = s_i - jnp.max(s_i, axis=-1, keepdims=True)
            e = jnp.exp(s_i)
            denom = jnp.sum(e, axis=-1, keepdims=True)
            a_i = e * pl.reciprocal(denom, approx=False)                 # exact
            a_parts.append(a_i)

    # (bc, S) attention-map columns for all (branch, query-row) pairs.
    A = jnp.concatenate(a_parts, axis=-1)
    # Single MXU matmul: per-branch Linear(w->p), lane scatter back to (w*p),
    # branch average (1/n) and bias all folded into lw/lb on the host.
    out = jnp.dot(A, lw_ref[...], preferred_element_type=jnp.float32) + lb_ref[...]
    o_ref[...] = out.astype(o_ref.dtype)


def _prepare_constants(params, w_size, patch_list):
    """Pack all per-branch Linear weights into 4 grid-constant arrays (traced, cheap)."""
    W = w_size
    n = len(patch_list)
    S = sum((W // p) ** 2 for p in patch_list)

    pw_cols, pb_cols = [], []
    lw = jnp.zeros((S, W), jnp.float32)
    lb = jnp.zeros((1, W), jnp.float32)
    row = 0
    for br, p in enumerate(patch_list):
        w = W // p
        wq, bq, wk, bk, wl, bl = params[br]
        eye = jnp.eye(w, dtype=jnp.float32)
        # Block-diagonal expansion so the (p,p) projection applies chunk-wise to
        # the flat (bc, W) slab:  y @ kron(I_w, Wq^T)  ==  per-chunk  z @ Wq^T.
        pw_cols += [jnp.kron(eye, wq.T.astype(jnp.float32)),
                    jnp.kron(eye, wk.T.astype(jnp.float32))]
        pb_cols += [jnp.tile(bq.reshape(1, p).astype(jnp.float32), (1, w)),
                    jnp.tile(bk.reshape(1, p).astype(jnp.float32), (1, w))]
        # Scatter-linear rows: column (br, i, j) of A maps to output lanes
        # [i*p, (i+1)*p) with weight Wl^T[j] / n  (branch average folded in).
        wlT = wl.T.astype(jnp.float32)                                   # (w, p)
        for i in range(w):
            for j in range(w):
                lw = lw.at[row + i * w + j, i * p:(i + 1) * p].set(wlT[j] / n)
        lb = lb + jnp.tile(bl.reshape(1, p).astype(jnp.float32), (1, w)) / n
        row += w * w

    pw = jnp.concatenate(pw_cols, axis=1)                                # (W, 2nW)
    pb = jnp.concatenate(pb_cols, axis=1)                                # (1, 2nW)
    return pw, pb, lw, lb


@partial(jax.jit, static_argnames=("w_size", "patch_list", "bc_tile"))
def inception_attention_block(x, params, w_size, patch_list, bc_tile=None):
    """x: (B, w_size, C) -> (B, w_size, C)."""
    B, W, C = x.shape
    assert W == w_size
    BC = B * C
    n_branches = len(patch_list)
    assert n_branches >= 1

    # 'b (w p) c -> (b c) (w p)'  — the ONLY input rearrange, shared by all branches.
    y = jnp.transpose(x, (0, 2, 1)).reshape(BC, W)

    pw, pb, lw, lb = _prepare_constants(params, w_size, patch_list)
    NP = pw.shape[1]           # 2 * n * W
    S = lw.shape[0]            # sum_i (W//p_i)^2

    # Lane-dense 2D blocks are tiny (W lanes), so large row tiles fit easily in
    # VMEM on every generation (v5e/v6e 128 MiB, v7x 64 MiB).  Whole BC in one
    # step when small; otherwise 1024-row tiles (multiple of 8) so big problems
    # still give several grid steps for v7x's 2-TC "parallel" sharding.
    if bc_tile is None:
        bc_tile = BC if BC <= 1024 else 1024
    bc_tile = min(bc_tile, BC)
    if bc_tile < BC:
        bc_tile = max(8, (bc_tile // 8) * 8)
    grid = (pl.cdiv(BC, bc_tile),)

    patch_info = tuple((w_size // p, p) for p in patch_list)
    kernel = partial(_inception_attention_kernel,
                     patch_info=patch_info, w_size=w_size)

    out = pl.pallas_call(
        kernel,
        out_shape=jax.ShapeDtypeStruct((BC, W), x.dtype),
        grid=grid,
        in_specs=[
            pl.BlockSpec((bc_tile, W), lambda j: (j, 0)),   # shared input slab
            pl.BlockSpec((W, NP), lambda j: (0, 0)),        # fused Q/K weights
            pl.BlockSpec((1, NP), lambda j: (0, 0)),        # fused Q/K biases
            pl.BlockSpec((S, W), lambda j: (0, 0)),         # scatter-linear
            pl.BlockSpec((1, W), lambda j: (0, 0)),         # averaged bias
        ],
        out_specs=pl.BlockSpec((bc_tile, W), lambda j: (j, 0)),
        compiler_params=pltpu.CompilerParams(
            dimension_semantics=("parallel",)),             # BC steps are independent
    )(y, pw, pb, lw, lb)

    # '(b c) (w p) -> b (w p) c' — the ONLY output rearrange.
    return out.reshape(B, C, W).transpose(0, 2, 1)


def init_params(key, w_size, patch_list):
    """kaiming_normal (fan_out, relu) weights, zero biases — matches the module's
    _initialize_weights for every nn.Linear.  Weight layouts follow nn.Linear:
    Wq/Wk: (p, p), Wl: (p, w); biases: (p,)."""
    params = []
    for p_size in patch_list:
        w = w_size // p_size
        key, k1, k2, k3 = jax.random.split(key, 4)
        std = math.sqrt(2.0 / p_size)          # fan_out = p for all three Linears
        wq = jax.random.normal(k1, (p_size, p_size), jnp.float32) * std
        wk = jax.random.normal(k2, (p_size, p_size), jnp.float32) * std
        wl = jax.random.normal(k3, (p_size, w), jnp.float32) * std
        bq = jnp.zeros((p_size,), jnp.float32)
        bk = jnp.zeros((p_size,), jnp.float32)
        bl = jnp.zeros((p_size,), jnp.float32)
        params.append((wq, bq, wk, bk, wl, bl))
    return params


def _reference(x, params, w_size, patch_list):
    """Pure-JAX reference matching the PyTorch forward (for correctness check)."""
    B, W, C = x.shape
    n = len(patch_list)
    y = jnp.transpose(x, (0, 2, 1)).reshape(B * C, W)
    outs = []
    for br, p in enumerate(patch_list):
        w = W // p
        wq, bq, wk, bk, wl, bl = params[br]
        z = y.reshape(B * C, w, p)
        q = jnp.einsum('bwp,qp->bwq', z, wq) + bq
        k = jnp.einsum('bwp,qp->bwq', z, wk) + bk
        s = jnp.einsum('bip,bjp->bij', q, k) / math.sqrt(p)
        a = jax.nn.softmax(s, axis=-1)
        o = jnp.einsum('bij,pj->bip', a, wl) + bl
        outs.append(o.reshape(B * C, W))
    res = sum(outs) / n
    return res.reshape(B, C, W).transpose(0, 2, 1)


if __name__ == "__main__":
    # Small shapes consistent with the module: w_size divisible by every patch size.
    w_size, in_dim, d_model = 40, 4, 32   # d_model unused by the forward math
    patch_list = (10, 20)
    B = 2

    key = jax.random.PRNGKey(0)
    kx, kp = jax.random.split(key)
    x = jax.random.normal(kx, (B, w_size, in_dim), jnp.float32)
    params = init_params(kp, w_size, patch_list)

    out = inception_attention_block(x, params, w_size, patch_list)
    out = jax.block_until_ready(out)
    assert out.shape == (B, w_size, in_dim), out.shape
    assert jnp.all(jnp.isfinite(out))

    ref = _reference(x, params, w_size, patch_list)
    assert jnp.allclose(out, ref, rtol=1e-5, atol=1e-5), \
        float(jnp.max(jnp.abs(out - ref)))

    print("KERNEL_OK")
</pallas_src>

<mosaic_0001>
module attributes {stable_mosaic.version = 11 : i64} {
  func.func @_inception_attention_kernel(%arg0: i32, %arg1: memref<8x40xf32, #tpu.memory_space<vmem>>, %arg2: memref<40x160xf32, #tpu.memory_space<vmem>>, %arg3: memref<1x160xf32, #tpu.memory_space<vmem>>, %arg4: memref<20x40xf32, #tpu.memory_space<vmem>>, %arg5: memref<1x40xf32, #tpu.memory_space<vmem>>, %arg6: memref<8x40xf32, #tpu.memory_space<vmem>>) attributes {dimension_semantics = [#tpu.dimension_semantics<parallel>], iteration_bounds = array<i64: 1>, scalar_prefetch = 0 : i64, scratch_operands = 0 : i64, tpu.core_type = #tpu.core_type<tc>, window_params = [{transform_indices = @transform_0, window_bounds = array<i64: 8, 40>}, {pipeline_mode = #tpu.pipeline_mode<synchronous>, transform_indices = @transform_1, window_bounds = array<i64: 40, 160>}, {pipeline_mode = #tpu.pipeline_mode<synchronous>, transform_indices = @transform_2, window_bounds = array<i64: 1, 160>}, {pipeline_mode = #tpu.pipeline_mode<synchronous>, transform_indices = @transform_3, window_bounds = array<i64: 20, 40>}, {pipeline_mode = #tpu.pipeline_mode<synchronous>, transform_indices = @transform_4, window_bounds = array<i64: 1, 40>}, {transform_indices = @transform_5, window_bounds = array<i64: 8, 40>}]} {
    %c0 = arith.constant 0 : index
    %c0_0 = arith.constant 0 : index
    %0 = vector.load %arg1[%c0, %c0_0] : memref<8x40xf32, #tpu.memory_space<vmem>>, vector<8x40xf32>
    %c0_1 = arith.constant 0 : index
    %c0_2 = arith.constant 0 : index
    %1 = vector.load %arg2[%c0_1, %c0_2] : memref<40x160xf32, #tpu.memory_space<vmem>>, vector<40x160xf32>
    %cst = arith.constant dense<0.000000e+00> : vector<8x160xf32>
    %2 = tpu.matmul %0, %1, %cst {dimension_numbers = #tpu.dot_dimension_numbers<[1], [0], [0], [1], [0, 0, 1, 1], [], []>} : vector<8x40xf32>, vector<40x160xf32>, vector<8x160xf32> -> vector<8x160xf32>
    %c0_3 = arith.constant 0 : index
    %c0_4 = arith.constant 0 : index
    %3 = vector.load %arg3[%c0_3, %c0_4] : memref<1x160xf32, #tpu.memory_space<vmem>>, vector<1x160xf32>
    %4 = vector.broadcast %3 : vector<1x160xf32> to vector<8x160xf32>
    %5 = arith.addf %2, %4 : vector<8x160xf32>
    %6 = vector.extract_strided_slice %5 {offsets = [0, 0], sizes = [8, 10], strides = [1, 1]} : vector<8x160xf32> to vector<8x10xf32>
    %7 = vector.extract_strided_slice %5 {offsets = [0, 40], sizes = [8, 10], strides = [1, 1]} : vector<8x160xf32> to vector<8x10xf32>
    %8 = arith.mulf %6, %7 : vector<8x10xf32>
    %cst_5 = arith.constant dense<0.000000e+00> : vector<8xf32>
    %9 = vector.multi_reduction <add>, %8, %cst_5 [1] : vector<8x10xf32> to vector<8xf32>
    %10 = vector.shape_cast %9 : vector<8xf32> to vector<8x1xf32>
    %11 = vector.extract_strided_slice %5 {offsets = [0, 50], sizes = [8, 10], strides = [1, 1]} : vector<8x160xf32> to vector<8x10xf32>
    %12 = arith.mulf %6, %11 : vector<8x10xf32>
    %cst_6 = arith.constant dense<0.000000e+00> : vector<8xf32>
    %13 = vector.multi_reduction <add>, %12, %cst_6 [1] : vector<8x10xf32> to vector<8xf32>
    %14 = vector.shape_cast %13 : vector<8xf32> to vector<8x1xf32>
    %15 = vector.extract_strided_slice %5 {offsets = [0, 60], sizes = [8, 10], strides = [1, 1]} : vector<8x160xf32> to vector<8x10xf32>
    %16 = arith.mulf %6, %15 : vector<8x10xf32>
    %cst_7 = arith.constant dense<0.000000e+00> : vector<8xf32>
    %17 = vector.multi_reduction <add>, %16, %cst_7 [1] : vector<8x10xf32> to vector<8xf32>
    %18 = vector.shape_cast %17 : vector<8xf32> to vector<8x1xf32>
    %19 = vector.extract_strided_slice %5 {offsets = [0, 70], sizes = [8, 10], strides = [1, 1]} : vector<8x160xf32> to vector<8x10xf32>
    %20 = arith.mulf %6, %19 : vector<8x10xf32>
    %cst_8 = arith.constant dense<0.000000e+00> : vector<8xf32>
    %21 = vector.multi_reduction <add>, %20, %cst_8 [1] : vector<8x10xf32> to vector<8xf32>
    %22 = vector.shape_cast %21 : vector<8xf32> to vector<8x1xf32>
    %23 = tpu.concatenate %10, %14, %18, %22 in 1 : vector<8x1xf32>, vector<8x1xf32>, vector<8x1xf32>, vector<8x1xf32> -> vector<8x4xf32>
    %cst_9 = arith.constant 0.316227764 : f32
    %24 = vector.broadcast %cst_9 : f32 to vector<8x4xf32>
    %25 = arith.mulf %23, %24 : vector<8x4xf32>
    %cst_10 = arith.constant dense<0xFF800000> : vector<8xf32>
    %26 = vector.multi_reduction <maximumf>, %25, %cst_10 [1] : vector<8x4xf32> to vector<8xf32>
    %27 = vector.shape_cast %26 : vector<8xf32> to vector<8x1xf32>
    %28 = vector.broadcast %27 : vector<8x1xf32> to vector<8x4xf32>
    %29 = arith.subf %25, %28 : vector<8x4xf32>
    %30 = math.exp %29 : vector<8x4xf32>
    %cst_11 = arith.constant dense<0.000000e+00> : vector<8xf32>
    %31 = vector.multi_reduction <add>, %30, %cst_11 [1] : vector<8x4xf32> to vector<8xf32>
    %32 = vector.shape_cast %31 : vector<8xf32> to vector<8x1xf32>
    %33 = tpu.reciprocal %32 : vector<8x1xf32> -> vector<8x1xf32>
    %34 = vector.broadcast %33 : vector<8x1xf32> to vector<8x4xf32>
    %35 = arith.mulf %30, %34 : vector<8x4xf32>
    %36 = vector.extract_strided_slice %5 {offsets = [0, 10], sizes = [8, 10], strides = [1, 1]} : vector<8x160xf32> to vector<8x10xf32>
    %37 = vector.extract_strided_slice %5 {offsets = [0, 40], sizes = [8, 10], strides = [1, 1]} : vector<8x160xf32> to vector<8x10xf32>
    %38 = arith.mulf %36, %37 : vector<8x10xf32>
    %cst_12 = arith.constant dense<0.000000e+00> : vector<8xf32>
    %39 = vector.multi_reduction <add>, %38, %cst_12 [1] : vector<8x10xf32> to vector<8xf32>
    %40 = vector.shape_cast %39 : vector<8xf32> to vector<8x1xf32>
    %41 = vector.extract_strided_slice %5 {offsets = [0, 50], sizes = [8, 10], strides = [1, 1]} : vector<8x160xf32> to vector<8x10xf32>
    %42 = arith.mulf %36, %41 : vector<8x10xf32>
    %cst_13 = arith.constant dense<0.000000e+00> : vector<8xf32>
    %43 = vector.multi_reduction <add>, %42, %cst_13 [1] : vector<8x10xf32> to vector<8xf32>
    %44 = vector.shape_cast %43 : vector<8xf32> to vector<8x1xf32>
    %45 = vector.extract_strided_slice %5 {offsets = [0, 60], sizes = [8, 10], strides = [1, 1]} : vector<8x160xf32> to vector<8x10xf32>
    %46 = arith.mulf %36, %45 : vector<8x10xf32>
    %cst_14 = arith.constant dense<0.000000e+00> : vector<8xf32>
    %47 = vector.multi_reduction <add>, %46, %cst_14 [1] : vector<8x10xf32> to vector<8xf32>
    %48 = vector.shape_cast %47 : vector<8xf32> to vector<8x1xf32>
    %49 = vector.extract_strided_slice %5 {offsets = [0, 70], sizes = [8, 10], strides = [1, 1]} : vector<8x160xf32> to vector<8x10xf32>
    %50 = arith.mulf %36, %49 : vector<8x10xf32>
    %cst_15 = arith.constant dense<0.000000e+00> : vector<8xf32>
    %51 = vector.multi_reduction <add>, %50, %cst_15 [1] : vector<8x10xf32> to vector<8xf32>
    %52 = vector.shape_cast %51 : vector<8xf32> to vector<8x1xf32>
    %53 = tpu.concatenate %40, %44, %48, %52 in 1 : vector<8x1xf32>, vector<8x1xf32>, vector<8x1xf32>, vector<8x1xf32> -> vector<8x4xf32>
    %cst_16 = arith.constant 0.316227764 : f32
    %54 = vector.broadcast %cst_16 : f32 to vector<8x4xf32>
    %55 = arith.mulf %53, %54 : vector<8x4xf32>
    %cst_17 = arith.constant dense<0xFF800000> : vector<8xf32>
    %56 = vector.multi_reduction <maximumf>, %55, %cst_17 [1] : vector<8x4xf32> to vector<8xf32>
    %57 = vector.shape_cast %56 : vector<8xf32> to vector<8x1xf32>
    %58 = vector.broadcast %57 : vector<8x1xf32> to vector<8x4xf32>
    %59 = arith.subf %55, %58 : vector<8x4xf32>
    %60 = math.exp %59 : vector<8x4xf32>
    %cst_18 = arith.constant dense<0.000000e+00> : vector<8xf32>
    %61 = vector.multi_reduction <add>, %60, %cst_18 [1] : vector<8x4xf32> to vector<8xf32>
    %62 = vector.shape_cast %61 : vector<8xf32> to vector<8x1xf32>
    %63 = tpu.reciprocal %62 : vector<8x1xf32> -> vector<8x1xf32>
    %64 = vector.broadcast %63 : vector<8x1xf32> to vector<8x4xf32>
    %65 = arith.mulf %60, %64 : vector<8x4xf32>
    %66 = vector.extract_strided_slice %5 {offsets = [0, 20], sizes = [8, 10], strides = [1, 1]} : vector<8x160xf32> to vector<8x10xf32>
    %67 = vector.extract_strided_slice %5 {offsets = [0, 40], sizes = [8, 10], strides = [1, 1]} : vector<8x160xf32> to vector<8x10xf32>
    %68 = arith.mulf %66, %67 : vector<8x10xf32>
    %cst_19 = arith.constant dense<0.000000e+00> : vector<8xf32>
    %69 = vector.multi_reduction <add>, %68, %cst_19 [1] : vector<8x10xf32> to vector<8xf32>
    %70 = vector.shape_cast %69 : vector<8xf32> to vector<8x1xf32>
    %71 = vector.extract_strided_slice %5 {offsets = [0, 50], sizes = [8, 10], strides = [1, 1]} : vector<8x160xf32> to vector<8x10xf32>
    %72 = arith.mulf %66, %71 : vector<8x10xf32>
    %cst_20 = arith.constant dense<0.000000e+00> : vector<8xf32>
    %73 = vector.multi_reduction <add>, %72, %cst_20 [1] : vector<8x10xf32> to vector<8xf32>
    %74 = vector.shape_cast %73 : vector<8xf32> to vector<8x1xf32>
    %75 = vector.extract_strided_slice %5 {offsets = [0, 60], sizes = [8, 10], strides = [1, 1]} : vector<8x160xf32> to vector<8x10xf32>
    %76 = arith.mulf %66, %75 : vector<8x10xf32>
    %cst_21 = arith.constant dense<0.000000e+00> : vector<8xf32>
    %77 = vector.multi_reduction <add>, %76, %cst_21 [1] : vector<8x10xf32> to vector<8xf32>
    %78 = vector.shape_cast %77 : vector<8xf32> to vector<8x1xf32>
    %79 = vector.extract_strided_slice %5 {offsets = [0, 70], sizes = [8, 10], strides = [1, 1]} : vector<8x160xf32> to vector<8x10xf32>
    %80 = arith.mulf %66, %79 : vector<8x10xf32>
    %cst_22 = arith.constant dense<0.000000e+00> : vector<8xf32>
    %81 = vector.multi_reduction <add>, %80, %cst_22 [1] : vector<8x10xf32> to vector<8xf32>
    %82 = vector.shape_cast %81 : vector<8xf32> to vector<8x1xf32>
    %83 = tpu.concatenate %70, %74, %78, %82 in 1 : vector<8x1xf32>, vector<8x1xf32>, vector<8x1xf32>, vector<8x1xf32> -> vector<8x4xf32>
    %cst_23 = arith.constant 0.316227764 : f32
    %84 = vector.broadcast %cst_23 : f32 to vector<8x4xf32>
    %85 = arith.mulf %83, %84 : vector<8x4xf32>
    %cst_24 = arith.constant dense<0xFF800000> : vector<8xf32>
    %86 = vector.multi_reduction <maximumf>, %85, %cst_24 [1] : vector<8x4xf32> to vector<8xf32>
    %87 = vector.shape_cast %86 : vector<8xf32> to vector<8x1xf32>
    %88 = vector.broadcast %87 : vector<8x1xf32> to vector<8x4xf32>
    %89 = arith.subf %85, %88 : vector<8x4xf32>
    %90 = math.exp %89 : vector<8x4xf32>
    %cst_25 = arith.constant dense<0.000000e+00> : vector<8xf32>
    %91 = vector.multi_reduction <add>, %90, %cst_25 [1] : vector<8x4xf32> to vector<8xf32>
    %92 = vector.shape_cast %91 : vector<8xf32> to vector<8x1xf32>
    %93 = tpu.reciprocal %92 : vector<8x1xf32> -> vector<8x1xf32>
    %94 = vector.broadcast %93 : vector<8x1xf32> to vector<8x4xf32>
    %95 = arith.mulf %90, %94 : vector<8x4xf32>
    %96 = vector.extract_strided_slice %5 {offsets = [0, 30], sizes = [8, 10], strides = [1, 1]} : vector<8x160xf32> to vector<8x10xf32>
    %97 = vector.extract_strided_slice %5 {offsets = [0, 40], sizes = [8, 10], strides = [1, 1]} : vector<8x160xf32> to vector<8x10xf32>
    %98 = arith.mulf %96, %97 : vector<8x10xf32>
    %cst_26 = arith.constant dense<0.000000e+00> : vector<8xf32>
    %99 = vector.multi_reduction <add>, %98, %cst_26 [1] : vector<8x10xf32> to vector<8xf32>
    %100 = vector.shape_cast %99 : vector<8xf32> to vector<8x1xf32>
    %101 = vector.extract_strided_slice %5 {offsets = [0, 50], sizes = [8, 10], strides = [1, 1]} : vector<8x160xf32> to vector<8x10xf32>
    %102 = arith.mulf %96, %101 : vector<8x10xf32>
    %cst_27 = arith.constant dense<0.000000e+00> : vector<8xf32>
    %103 = vector.multi_reduction <add>, %102, %cst_27 [1] : vector<8x10xf32> to vector<8xf32>
    %104 = vector.shape_cast %103 : vector<8xf32> to vector<8x1xf32>
    %105 = vector.extract_strided_slice %5 {offsets = [0, 60], sizes = [8, 10], strides = [1, 1]} : vector<8x160xf32> to vector<8x10xf32>
    %106 = arith.mulf %96, %105 : vector<8x10xf32>
    %cst_28 = arith.constant dense<0.000000e+00> : vector<8xf32>
    %107 = vector.multi_reduction <add>, %106, %cst_28 [1] : vector<8x10xf32> to vector<8xf32>
    %108 = vector.shape_cast %107 : vector<8xf32> to vector<8x1xf32>
    %109 = vector.extract_strided_slice %5 {offsets = [0, 70], sizes = [8, 10], strides = [1, 1]} : vector<8x160xf32> to vector<8x10xf32>
    %110 = arith.mulf %96, %109 : vector<8x10xf32>
    %cst_29 = arith.constant dense<0.000000e+00> : vector<8xf32>
    %111 = vector.multi_reduction <add>, %110, %cst_29 [1] : vector<8x10xf32> to vector<8xf32>
    %112 = vector.shape_cast %111 : vector<8xf32> to vector<8x1xf32>
    %113 = tpu.concatenate %100, %104, %108, %112 in 1 : vector<8x1xf32>, vector<8x1xf32>, vector<8x1xf32>, vector<8x1xf32> -> vector<8x4xf32>
    %cst_30 = arith.constant 0.316227764 : f32
    %114 = vector.broadcast %cst_30 : f32 to vector<8x4xf32>
    %115 = arith.mulf %113, %114 : vector<8x4xf32>
    %cst_31 = arith.constant dense<0xFF800000> : vector<8xf32>
    %116 = vector.multi_reduction <maximumf>, %115, %cst_31 [1] : vector<8x4xf32> to vector<8xf32>
    %117 = vector.shape_cast %116 : vector<8xf32> to vector<8x1xf32>
    %118 = vector.broadcast %117 : vector<8x1xf32> to vector<8x4xf32>
    %119 = arith.subf %115, %118 : vector<8x4xf32>
    %120 = math.exp %119 : vector<8x4xf32>
    %cst_32 = arith.constant dense<0.000000e+00> : vector<8xf32>
    %121 = vector.multi_reduction <add>, %120, %cst_32 [1] : vector<8x4xf32> to vector<8xf32>
    %122 = vector.shape_cast %121 : vector<8xf32> to vector<8x1xf32>
    %123 = tpu.reciprocal %122 : vector<8x1xf32> -> vector<8x1xf32>
    %124 = vector.broadcast %123 : vector<8x1xf32> to vector<8x4xf32>
    %125 = arith.mulf %120, %124 : vector<8x4xf32>
    %126 = vector.extract_strided_slice %5 {offsets = [0, 80], sizes = [8, 20], strides = [1, 1]} : vector<8x160xf32> to vector<8x20xf32>
    %127 = vector.extract_strided_slice %5 {offsets = [0, 120], sizes = [8, 20], strides = [1, 1]} : vector<8x160xf32> to vector<8x20xf32>
    %128 = arith.mulf %126, %127 : vector<8x20xf32>
    %cst_33 = arith.constant dense<0.000000e+00> : vector<8xf32>
    %129 = vector.multi_reduction <add>, %128, %cst_33 [1] : vector<8x20xf32> to vector<8xf32>
    %130 = vector.shape_cast %129 : vector<8xf32> to vector<8x1xf32>
    %131 = vector.extract_strided_slice %5 {offsets = [0, 140], sizes = [8, 20], strides = [1, 1]} : vector<8x160xf32> to vector<8x20xf32>
    %132 = arith.mulf %126, %131 : vector<8x20xf32>
    %cst_34 = arith.constant dense<0.000000e+00> : vector<8xf32>
    %133 = vector.multi_reduction <add>, %132, %cst_34 [1] : vector<8x20xf32> to vector<8xf32>
    %134 = vector.shape_cast %133 : vector<8xf32> to vector<8x1xf32>
    %135 = tpu.concatenate %130, %134 in 1 : vector<8x1xf32>, vector<8x1xf32> -> vector<8x2xf32>
    %cst_35 = arith.constant 0.223606795 : f32
    %136 = vector.broadcast %cst_35 : f32 to vector<8x2xf32>
    %137 = arith.mulf %135, %136 : vector<8x2xf32>
    %cst_36 = arith.constant dense<0xFF800000> : vector<8xf32>
    %138 = vector.multi_reduction <maximumf>, %137, %cst_36 [1] : vector<8x2xf32> to vector<8xf32>
    %139 = vector.shape_cast %138 : vector<8xf32> to vector<8x1xf32>
    %140 = vector.broadcast %139 : vector<8x1xf32> to vector<8x2xf32>
    %141 = arith.subf %137, %140 : vector<8x2xf32>
    %142 = math.exp %141 : vector<8x2xf32>
    %cst_37 = arith.constant dense<0.000000e+00> : vector<8xf32>
    %143 = vector.multi_reduction <add>, %142, %cst_37 [1] : vector<8x2xf32> to vector<8xf32>
    %144 = vector.shape_cast %143 : vector<8xf32> to vector<8x1xf32>
    %145 = tpu.reciprocal %144 : vector<8x1xf32> -> vector<8x1xf32>
    %146 = vector.broadcast %145 : vector<8x1xf32> to vector<8x2xf32>
    %147 = arith.mulf %142, %146 : vector<8x2xf32>
    %148 = vector.extract_strided_slice %5 {offsets = [0, 100], sizes = [8, 20], strides = [1, 1]} : vector<8x160xf32> to vector<8x20xf32>
    %149 = vector.extract_strided_slice %5 {offsets = [0, 120], sizes = [8, 20], strides = [1, 1]} : vector<8x160xf32> to vector<8x20xf32>
    %150 = arith.mulf %148, %149 : vector<8x20xf32>
    %cst_38 = arith.constant dense<0.000000e+00> : vector<8xf32>
    %151 = vector.multi_reduction <add>, %150, %cst_38 [1] : vector<8x20xf32> to vector<8xf32>
    %152 = vector.shape_cast %151 : vector<8xf32> to vector<8x1xf32>
    %153 = vector.extract_strided_slice %5 {offsets = [0, 140], sizes = [8, 20], strides = [1, 1]} : vector<8x160xf32> to vector<8x20xf32>
    %154 = arith.mulf %148, %153 : vector<8x20xf32>
    %cst_39 = arith.constant dense<0.000000e+00> : vector<8xf32>
    %155 = vector.multi_reduction <add>, %154, %cst_39 [1] : vector<8x20xf32> to vector<8xf32>
    %156 = vector.shape_cast %155 : vector<8xf32> to vector<8x1xf32>
    %157 = tpu.concatenate %152, %156 in 1 : vector<8x1xf32>, vector<8x1xf32> -> vector<8x2xf32>
    %cst_40 = arith.constant 0.223606795 : f32
    %158 = vector.broadcast %cst_40 : f32 to vector<8x2xf32>
    %159 = arith.mulf %157, %158 : vector<8x2xf32>
    %cst_41 = arith.constant dense<0xFF800000> : vector<8xf32>
    %160 = vector.multi_reduction <maximumf>, %159, %cst_41 [1] : vector<8x2xf32> to vector<8xf32>
    %161 = vector.shape_cast %160 : vector<8xf32> to vector<8x1xf32>
    %162 = vector.broadcast %161 : vector<8x1xf32> to vector<8x2xf32>
    %163 = arith.subf %159, %162 : vector<8x2xf32>
    %164 = math.exp %163 : vector<8x2xf32>
    %cst_42 = arith.constant dense<0.000000e+00> : vector<8xf32>
    %165 = vector.multi_reduction <add>, %164, %cst_42 [1] : vector<8x2xf32> to vector<8xf32>
    %166 = vector.shape_cast %165 : vector<8xf32> to vector<8x1xf32>
    %167 = tpu.reciprocal %166 : vector<8x1xf32> -> vector<8x1xf32>
    %168 = vector.broadcast %167 : vector<8x1xf32> to vector<8x2xf32>
    %169 = arith.mulf %164, %168 : vector<8x2xf32>
    %170 = tpu.concatenate %35, %65, %95, %125, %147, %169 in 1 : vector<8x4xf32>, vector<8x4xf32>, vector<8x4xf32>, vector<8x4xf32>, vector<8x2xf32>, vector<8x2xf32> -> vector<8x20xf32>
    %c0_43 = arith.constant 0 : index
    %c0_44 = arith.constant 0 : index
    %171 = vector.load %arg4[%c0_43, %c0_44] : memref<20x40xf32, #tpu.memory_space<vmem>>, vector<20x40xf32>
    %cst_45 = arith.constant dense<0.000000e+00> : vector<8x40xf32>
    %172 = tpu.matmul %170, %171, %cst_45 {dimension_numbers = #tpu.dot_dimension_numbers<[1], [0], [0], [1], [0, 0, 1, 1], [], []>} : vector<8x20xf32>, vector<20x40xf32>, vector<8x40xf32> -> vector<8x40xf32>
    %c0_46 = arith.constant 0 : index
    %c0_47 = arith.constant 0 : index
    %173 = vector.load %arg5[%c0_46, %c0_47] : memref<1x40xf32, #tpu.memory_space<vmem>>, vector<1x40xf32>
    %174 = vector.broadcast %173 : vector<1x40xf32> to vector<8x40xf32>
    %175 = arith.addf %172, %174 : vector<8x40xf32>
    %c0_48 = arith.constant 0 : index
    %c0_49 = arith.constant 0 : index
    %176 = vector.load %arg6[%c0_48, %c0_49] : memref<8x40xf32, #tpu.memory_space<vmem>>, vector<8x40xf32>
    tpu.vector_store %arg6[%c0_48, %c0_49], %175 {strides = array<i32>} : memref<8x40xf32, #tpu.memory_space<vmem>>, vector<8x40xf32>,
    return
  }
  func.func @transform_0(%arg0: i32) -> (i32, i32) {
    %c0_i32 = arith.constant 0 : i32
    %c0_i32_0 = arith.constant 0 : i32
    return %arg0, %c0_i32 : i32, i32
  }
  func.func @transform_1(%arg0: i32) -> (i32, i32) {
    %c0_i32 = arith.constant 0 : i32
    %c0_i32_0 = arith.constant 0 : i32
    %c0_i32_1 = arith.constant 0 : i32
    return %c0_i32, %c0_i32_0 : i32, i32
  }
  func.func @transform_2(%arg0: i32) -> (i32, i32) {
    %c0_i32 = arith.constant 0 : i32
    %c0_i32_0 = arith.constant 0 : i32
    %c0_i32_1 = arith.constant 0 : i32
    return %c0_i32, %c0_i32_0 : i32, i32
  }
  func.func @transform_3(%arg0: i32) -> (i32, i32) {
    %c0_i32 = arith.constant 0 : i32
    %c0_i32_0 = arith.constant 0 : i32
    %c0_i32_1 = arith.constant 0 : i32
    return %c0_i32, %c0_i32_0 : i32, i32
  }
  func.func @transform_4(%arg0: i32) -> (i32, i32) {
    %c0_i32 = arith.constant 0 : i32
    %c0_i32_0 = arith.constant 0 : i32
    %c0_i32_1 = arith.constant 0 : i32
    return %c0_i32, %c0_i32_0 : i32, i32
  }
  func.func @transform_5(%arg0: i32) -> (i32, i32) {
    %c0_i32 = arith.constant 0 : i32
    %c0_i32_0 = arith.constant 0 : i32
    return %arg0, %c0_i32 : i32, i32
  }
}

</mosaic_0001>

<bundles_post_ra>
// kernel: inception_attention_block.1
= control target key start
LH: loop header
LB: loop body
LE: loop exit
PB: predicated region body
PF: predicated region fallthrough
CT: control target
= control target key end

     0   :  { %v588_v4 = vmov 0.0   ;;  %s776_s0 = inlined_call_operand.vmem [shape: f32[8,40], index: 0, kind: input, shape index: {}]   ;;  %s777_s1 = inlined_call_operand.vmem [shape: f32[40,160], index: 1, kind: input, shape index: {}]   ;;  %s778_s2 = inlined_call_operand.vmem [shape: f32[1,160], index: 2, kind: input, shape index: {}]   ;;  %s779_s3 = inlined_call_operand.vmem [shape: f32[20,40], index: 3, kind: input, shape index: {}]   ;;  %s780_s4 = inlined_call_operand.vmem [shape: f32[1,40], index: 4, kind: input, shape index: {}]   ;;  %s781_s5 = inlined_call_operand.hbm [shape: f32[8,40], index: 5, kind: output, shape index: {}]  }
   0x1   :  { %v31_v0 = vld [vmem:[%s777_s1 + $0x48] sm:$0xff]  ;;  %v30_v1 = vld [vmem:[%s777_s1 + $0x40] sm:$0xff]  ;;  %v29_v2 = vld [vmem:[%s777_s1 + $0x38] sm:$0xff]  ;;  %112 = vmatprep.mubr.f32.mxu0 %v588_v4  ;;  %516 = vmatprep.subr.mxu1 %v588_v4 }
   0x2   :  { %70 = vmatprep.subr.mxu0 %v31_v0  ;;  %v28_v3 = vld [vmem:[%s777_s1 + $0x30] sm:$0xff]  ;;  %v27_v5 = vld [vmem:[%s777_s1 + $0x28] sm:$0xff]  ;;  %v26_v6 = vld [vmem:[%s777_s1 + $0x20] sm:$0xff] }
   0x3   :  { %71 = vmatpush1.msra.mxu0 %v30_v1  ;;  %v25_v7 = vld [vmem:[%s777_s1 + $0x18] sm:$0xff] }
   0x4   :  { %72 = vmatprep.subr.mxu0 %v29_v2 }
   0x5   :  { %73 = vmatpush1.msra.mxu0 %v28_v3 }
   0x6   :  { %10 = vsyncpa [#allocation3], 0  ;;  %74 = vmatprep.subr.mxu0 %v27_v5  ;;  %v24_v8 = vld [vmem:[%s777_s1 + $0x10] sm:$0xff]  ;;  %v23_v9 = vld [vmem:[%s777_s1 + $0x8] sm:$0xff]  ;;  %vm44_vm0 = vcmask 326656   ;;  %v34_v12 = vlaneseq  ;;  %s591_s17 = smov 108  }
   0x7   :  { %75 = vmatpush1.msra.mxu0 %v26_v6  ;;  %v22_v10 = vld [vmem:[%s777_s1] sm:$0xff]  ;;  %s589_s1 = smov 78   ;;  %s592_s18 = smov 98   ;;  %vm306_vm1 = vcmask 719872   ;;  %vm344_vm2 = vcmask 883712   ;;  %vm124_vm3 = vcmask 80896  }
   0x8   :  { %76 = vmatprep.subr.mxu0 %v25_v7  ;;  %v21_v11 = vld [vmem:[%s776_s0] sm:$0xff]  ;;  %v35_v13 = vshrl.u32 %v34_v12, 7  ;;  %s590_s0 = smov 88   ;;  %s594_s19 = smov 68   ;;  %vm314_vm4 = vcmask 162816   ;;  %vm149_vm5 = vcmask 7168  }
   0x9   :  { %77 = vmatpush1.msra.mxu0 %v24_v8  ;;  %v32_v15 = vld [vmem:[%s778_s2] sm:$0x3]  ;;  %s593_s2 = smov 118   ;;  %s595_s20 = smov 48   ;;  %vm151_vm6 = vcmask 15360   ;;  %vm153_vm7 = vcmask 23552  }
   0xa   :  { %78 = vmatprep.subr.mxu0 %v23_v9  ;;  %v36_v14 = vsub.s32 0, %v35_v13  ;;  %v40_v19 = vsub.s32 1, %v35_v13  ;;  %s596_s21 = smov 28   ;;  %s597_s22 = smov 58   ;;  %vm156_vm8 = vcmask 31744   ;;  %vm419_vm9 = vcmask 1043456  }
   0xb   :  { %79 = vmatpush1.msra.mxu0 %v22_v10  ;;  %s598_s27 = smov 4   ;;  %vm599_vm10 = vmmov 0   ;;  %s600_s30 = smov 8   ;;  %vm398_vm11 = vcmask 64512   ;;  %vm400_vm12 = vcmask 97280   ;;  %vm402_vm13 = vcmask 130048  }
   0xc   :  { %508 = vmatmul.mubr.msk.f32.vlgmr.msra.gmra.mxu0 %vm44_vm0, %v21_v11  ;;  %v37_v16 = vrot.slane %v32_v15, %v36_v14  ;;  %v41_v20 = vrot.slane %v32_v15, %v40_v19  ;;  %522 = vmatprep.mubr.msk.f32.mxu1 %vm599_vm10, %v588_v4  ;;  %s601_s6 = smov 12   ;;  %s602_s7 = smov 16   ;;  %vm404_vm14 = vcmask 146432  }
   0xd   :  { %s603_s8 = smov 18   ;;  %s604_s10 = smov [#allocation2]  }
   0xe   :  { %s500_s11 = sshll.u32 %s604_s10, 4  ;;  %s501_s11 = int_to_ptr.vmem [resolvable:$true] %s500_s11 }
   0xf   :  { %s566_s12 = scalar_lea.vmem %s501_s11, 128  ;;  %p571_p1 = scmp.lt.s32.totalorder %s501_s11, %s501_s11 }
  0x10   :  { %p567_p0 = scmp.ne.s32.totalorder %s501_s11, %s566_s12  ;;  %p572_p2 = scmp.lt.s32.totalorder %s566_s12, %s566_s12 }
  0x12   :  { %p573_p3 = por %p572_p2, %p571_p1 }
  0x14   :  { %p574_p4 = pnand %p573_p3, %p567_p0 }
  0xcc   :  { %v114_v17 = vpop.f32.mrf.mxu0 }
  0xcd   :  { %v674_v18 = vadd.f32 %v114_v17, %v37_v16 }
  0xce   :  { %v116_v21 = vpop.f32.mrf.mxu0 }
  0xcf   :  { %128 = vrot.lane.b32.xlu1 %v674_v18, %s589_s1  ;;  %120 = vrot.lane.b32.xlu0 %v674_v18, %s590_s0  ;;  %v117_v22 = vadd.f32 %v116_v21, %v41_v20 }
  0xd3   :  { %215 = vrot.lane.b32.xlu1 %v674_v18, %s591_s17  ;;  %168 = vrot.lane.b32.xlu0 %v674_v18, %s592_s18 }
  0xd7   :  { %259 = vrot.lane.b32.xlu1 %v674_v18, %s593_s2  ;;  %135 = vrot.lane.b32.xlu0 %v674_v18, %s594_s19 }
  0xdb   :  { %318 = vrot.lane.b32.xlu1 %v117_v22, %s594_s19  ;;  %304 = vrot.lane.b32.xlu0 %v117_v22, %s590_s0 }
  0xdf   :  { %342 = vrot.lane.b32.xlu0 %v117_v22, %s591_s17 }
 0x141   :  { %v129_v23 = vpop.permute.xlu1 %128  ;;  %v121_v24 = vpop.permute.xlu0 %120 }
 0x142   :  { %v123_v25 = vmul.f32 %v121_v24, %v674_v18  ;;  %v131_v31 = vmul.f32 %v129_v23, %v674_v18 }
 0x144   :  { %180 = vrot.lane.b32.xlu0 %v123_v25, %s593_s2  ;;  %v132_v44 = vsel %vm124_vm3, %v131_v31, 0.0  ;;  %v125_v46 = vsel %vm124_vm3, %v123_v25, 0.0 }
 0x145   :  { %v216_v26 = vpop.permute.xlu1 %215  ;;  %v169_v27 = vpop.permute.xlu0 %168 }
 0x146   :  { %v218_v28 = vmul.f32 %v216_v26, %v674_v18  ;;  %v171_v29 = vmul.f32 %v169_v27, %v674_v18 }
 0x148   :  { %220 = vrot.lane.b32.xlu0 %v218_v28, %s591_s17  ;;  %173 = vrot.lane.b32.xlu1 %v171_v29, %s593_s2 }
 0x149   :  { %v136_v30 = vpop.permute.xlu0 %135  ;;  %v260_v33 = vpop.permute.xlu1 %259 }
 0x14a   :  { %v138_v32 = vmul.f32 %v136_v30, %v674_v18  ;;  %v262_v34 = vmul.f32 %v260_v33, %v674_v18 }
 0x14c   :  { %187 = vrot.lane.b32.xlu1 %v131_v31, %s593_s2  ;;  %194 = vrot.lane.b32.xlu0 %v138_v32, %s593_s2  ;;  %v139_v45 = vsel %vm124_vm3, %v138_v32, 0.0 }
 0x14d   :  { %v305_v35 = vpop.permute.xlu0 %304  ;;  %v319_v36 = vpop.permute.xlu1 %318 }
 0x14e   :  { %v321_v37 = vmul.f32 %v319_v36, %v674_v18  ;;  %v307_v38 = vsel %vm306_vm1, %v121_v24, %v305_v35  ;;  %v356_v41 = vmul.f32 %v305_v35, %v674_v18 }
 0x14f   :  { %v309_v40 = vmul.f32 %v307_v38, %v674_v18 }
 0x150   :  { %226 = vrot.lane.b32.xlu1 %v171_v29, %s591_s17  ;;  %264 = vrot.lane.b32.xlu0 %v262_v34, %s592_s18 }
 0x151   :  { %v343_v39 = vpop.permute.xlu0 %342 }
 0x152   :  { %v345_v42 = vsel %vm344_vm2, %v216_v26, %v343_v39 }
 0x153   :  { %v347_v43 = vmul.f32 %v345_v42, %v674_v18 }
 0x154   :  { %232 = vrot.lane.b32.xlu1 %v123_v25, %s591_s17  ;;  %238 = vrot.lane.b32.xlu0 %v131_v31, %s591_s17 }
 0x158   :  { %270 = vrot.lane.b32.xlu1 %v218_v28, %s592_s18  ;;  %282 = vrot.lane.b32.xlu0 %v123_v25, %s592_s18 }
 0x15c   :  { %276 = vrot.lane.b32.xlu1 %v171_v29, %s592_s18  ;;  %323 = vrot.lane.b32.xlu0 %v321_v37, %s595_s20 }
 0x160   :  { %358 = vrot.lane.b32.xlu0 %v356_v41, %s596_s21  ;;  %311 = vrot.lane.b32.xlu1 %v309_v40, %s595_s20 }
 0x164   :  { %349 = vrot.lane.b32.xlu1 %v347_v43, %s596_s21 }
 0x17f   :  { %133 = vadd.xlane.f32.xlu0 %v132_v44 }
 0x183   :  { %140 = vadd.xlane.f32.xlu0 %v139_v45 }
 0x188   :  { %126 = vadd.xlane.f32.xlu1 %v125_v46 }
 0x199   :  { %142 = vrot.lane.b32.xlu1 %v674_v18, %s597_s22 }
 0x1b6   :  { %v181_v49 = vpop.permute.xlu0 %180 }
 0x1b7   :  { %v183_v51 = vsel %vm124_vm3, %v181_v49, 0.0 }
 0x1ba   :  { %v174_v47 = vpop.permute.xlu1 %173  ;;  %v221_v52 = vpop.permute.xlu0 %220 }
 0x1bb   :  { %v176_v48 = vsel %vm124_vm3, %v174_v47, 0.0  ;;  %v223_v57 = vsel %vm124_vm3, %v221_v52, 0.0 }
 0x1bc   :  { %177 = vadd.xlane.f32.xlu0 %v176_v48 }
 0x1be   :  { %v188_v50 = vpop.permute.xlu1 %187  ;;  %v195_v58 = vpop.permute.xlu0 %194 }
 0x1bf   :  { %v190_v55 = vsel %vm124_vm3, %v188_v50, 0.0  ;;  %v197_v60 = vsel %vm124_vm3, %v195_v58, 0.0 }
 0x1c0   :  { %184 = vadd.xlane.f32.xlu0 %v183_v51 }
 0x1c2   :  { %v227_v53 = vpop.permute.xlu1 %226  ;;  %v265_v63 = vpop.permute.xlu0 %264 }
 0x1c3   :  { %v229_v54 = vsel %vm124_vm3, %v227_v53, 0.0  ;;  %v267_v1 = vsel %vm124_vm3, %v265_v63, 0.0 }
 0x1c4   :  { %230 = vadd.xlane.f32.xlu1 %v229_v54  ;;  %191 = vadd.xlane.f32.xlu0 %v190_v55 }
 0x1c6   :  { %v233_v56 = vpop.permute.xlu1 %232  ;;  %v239_v6 = vpop.permute.xlu0 %238 }
 0x1c7   :  { %v235_v62 = vsel %vm124_vm3, %v233_v56, 0.0  ;;  %v241_v7 = vsel %vm124_vm3, %v239_v6, 0.0 }
 0x1c8   :  { %224 = vadd.xlane.f32.xlu0 %v223_v57 }
 0x1ca   :  { %v271_v59 = vpop.permute.xlu1 %270  ;;  %v283_v8 = vpop.permute.xlu0 %282 }
 0x1cb   :  { %v273_v5 = vsel %vm124_vm3, %v271_v59, 0.0  ;;  %v285_v10 = vsel %vm124_vm3, %v283_v8, 0.0 }
 0x1cc   :  { %198 = vadd.xlane.f32.xlu0 %v197_v60 }
 0x1ce   :  { %v277_v61 = vpop.permute.xlu1 %276  ;;  %v324_v11 = vpop.permute.xlu0 %323 }
 0x1cf   :  { %v279_v9 = vsel %vm124_vm3, %v277_v61, 0.0  ;;  %v326_v12 = vsel %vm314_vm4, %v324_v11, 0.0 }
 0x1d0   :  { %236 = vadd.xlane.f32.xlu0 %v235_v62 }
 0x1d2   :  { %v312_v0 = vpop.permute.xlu1 %311  ;;  %v359_v14 = vpop.permute.xlu0 %358 }
 0x1d3   :  { %v315_v13 = vsel %vm314_vm4, %v312_v0, 0.0  ;;  %v361_v15 = vsel %vm314_vm4, %v359_v14, 0.0 }
 0x1d4   :  { %268 = vadd.xlane.f32.xlu0 %v267_v1 }
 0x1d6   :  { %v350_v2 = vpop.permute.xlu1 %349 }
 0x1d7   :  { %v352_v3 = vsel %vm314_vm4, %v350_v2, 0.0 }
 0x1d8   :  { %353 = vadd.xlane.f32.xlu1 %v352_v3  ;;  %274 = vadd.xlane.f32.xlu0 %v273_v5 }
 0x1dc   :  { %242 = vadd.xlane.f32.xlu0 %v241_v7 }
 0x1e0   :  { %280 = vadd.xlane.f32.xlu0 %v279_v9 }
 0x1e4   :  { %286 = vadd.xlane.f32.xlu0 %v285_v10 }
 0x1e8   :  { %327 = vadd.xlane.f32.xlu0 %v326_v12 }
 0x1ec   :  { %316 = vadd.xlane.f32.xlu0 %v315_v13 }
 0x1f0   :  { %362 = vadd.xlane.f32.xlu0 %v361_v15 }
 0x208   :  { %v134_v21 = vpop.xlane.xlu0 %133 }
 0x20c   :  { %v141_v22 = vpop.xlane.xlu0 %140 }
 0x211   :  { %v127_v16 = vpop.xlane.xlu1 %126 }
 0x215   :  { %v143_v17 = vpop.permute.xlu1 %142 }
 0x216   :  { %v145_v19 = vmul.f32 %v143_v17, %v674_v18  ;;  %v150_v18 = vsel %vm149_vm5, %v127_v16, %v134_v21 }
 0x217   :  { %v152_v39 = vsel %vm151_vm6, %v150_v18, %v141_v22 }
 0x218   :  { %v146_v20 = vsel %vm124_vm3, %v145_v19, 0.0 }
 0x219   :  { %147 = vadd.xlane.f32.xlu1 %v146_v20 }
 0x245   :  { %v178_v23 = vpop.xlane.xlu0 %177 }
 0x249   :  { %v185_v24 = vpop.xlane.xlu0 %184 }
 0x24a   :  { %v200_v36 = vsel %vm149_vm5, %v178_v23, %v185_v24 }
 0x24d   :  { %v192_v25 = vpop.xlane.xlu0 %191  ;;  %v231_v33 = vpop.xlane.xlu1 %230 }
 0x24e   :  { %v201_v37 = vsel %vm151_vm6, %v200_v36, %v192_v25 }
 0x251   :  { %v225_v26 = vpop.xlane.xlu0 %224 }
 0x252   :  { %v244_v44 = vsel %vm149_vm5, %v225_v26, %v231_v33 }
 0x255   :  { %v199_v27 = vpop.xlane.xlu0 %198 }
 0x256   :  { %v202_v40 = vsel %vm153_vm7, %v201_v37, %v199_v27 }
 0x257   :  { %v203_v45 = vmul.f32 0.31622776, %v202_v40 }
 0x259   :  { %v237_v28 = vpop.xlane.xlu0 %236  ;;  %v204_v53 = vsel %vm156_vm8, %v203_v45, -inf }
 0x25a   :  { %v245_v46 = vsel %vm151_vm6, %v244_v44, %v237_v28  ;;  %v406_v44 = vld [vmem:[%s779_s3] sm:$0xff] }
 0x25d   :  { %v269_v29 = vpop.xlane.xlu0 %268 }
 0x261   :  { %v275_v30 = vpop.xlane.xlu0 %274  ;;  %v354_v34 = vpop.xlane.xlu1 %353 }
 0x262   :  { %v288_v49 = vsel %vm149_vm5, %v269_v29, %v275_v30 }
 0x265   :  { %v243_v31 = vpop.xlane.xlu0 %242 }
 0x266   :  { %v246_v48 = vsel %vm153_vm7, %v245_v46, %v243_v31 }
 0x267   :  { %v247_v50 = vmul.f32 0.31622776, %v246_v48 }
 0x269   :  { %v281_v32 = vpop.xlane.xlu0 %280  ;;  %v248_v56 = vsel %vm156_vm8, %v247_v50, -inf }
 0x26a   :  { %v289_v51 = vsel %vm151_vm6, %v288_v49, %v281_v32 }
 0x26d   :  { %v287_v35 = vpop.xlane.xlu0 %286 }
 0x26e   :  { %v290_v54 = vsel %vm153_vm7, %v289_v51, %v287_v35 }
 0x26f   :  { %v291_v55 = vmul.f32 0.31622776, %v290_v54 }
 0x271   :  { %v328_v42 = vpop.xlane.xlu0 %327  ;;  %v292_v60 = vsel %vm156_vm8, %v291_v55, -inf }
 0x275   :  { %v317_v52 = vpop.xlane.xlu0 %316 }
 0x276   :  { %v329_v57 = vsel %vm149_vm5, %v317_v52, %v328_v42 }
 0x277   :  { %v330_v59 = vmul.f32 0.2236068, %v329_v57 }
 0x279   :  { %v363_v58 = vpop.xlane.xlu0 %362  ;;  %v331_v63 = vsel %vm151_vm6, %v330_v59, -inf }
 0x27a   :  { %v364_v61 = vsel %vm149_vm5, %v354_v34, %v363_v58 }
 0x27b   :  { %v365_v62 = vmul.f32 0.2236068, %v364_v61 }
 0x27d   :  { %v366_v0 = vsel %vm151_vm6, %v365_v62, -inf }
 0x2a2   :  { %v148_v38 = vpop.xlane.xlu1 %147 }
 0x2a3   :  { %v154_v41 = vsel %vm153_vm7, %v152_v39, %v148_v38  ;;  %v408_v39 = vld [vmem:[%s779_s3 + $0x10] sm:$0xf] }
 0x2a4   :  { %v155_v43 = vmul.f32 0.31622776, %v154_v41  ;;  %517 = vmatpush3.msk.msra.mxu1 %vm419_vm9, %v408_v39  ;;  %v407_v41 = vld [vmem:[%s779_s3 + $0x8] sm:$0xff] }
 0x2a5   :  { %518 = vmatprep.subr.mxu1 %v588_v4 }
 0x2a6   :  { %v157_v47 = vsel %vm156_vm8, %v155_v43, -inf  ;;  %519 = vmatpush3.msra.mxu1 %v407_v41 }
 0x2a7   :  { %158 = vmax.xlane.f32.xlu0 %v157_v47  ;;  %520 = vmatprep.subr.mxu1 %v588_v4 }
 0x2a8   :  { %521 = vmatpush3.msra.mxu1 %v406_v44 }
 0x2ab   :  { %205 = vmax.xlane.f32.xlu0 %v204_v53 }
 0x2af   :  { %249 = vmax.xlane.f32.xlu0 %v248_v56 }
 0x2b3   :  { %293 = vmax.xlane.f32.xlu0 %v292_v60 }
 0x2b7   :  { %332 = vmax.xlane.f32.xlu0 %v331_v63 }
 0x2bb   :  { %367 = vmax.xlane.f32.xlu0 %v366_v0 }
 0x330   :  { %v159_v1 = vpop.xlane.xlu0 %158 }
 0x331   :  { %v160_v2 = vsub.f32 %v155_v43, %v159_v1 }
 0x333   :  { %v161_v3 = vmul.f32 1.442695, %v160_v2 }
 0x334   :  { %v206_v5 = vpop.xlane.xlu0 %205 }
 0x335   :  { %542 = vpow2.f32 %v161_v3  ;;  %v207_v6 = vsub.f32 %v203_v45, %v206_v5 }
 0x337   :  { %v208_v7 = vmul.f32 1.442695, %v207_v6 }
 0x338   :  { %v250_v8 = vpop.xlane.xlu0 %249 }
 0x339   :  { %544 = vpow2.f32 %v208_v7  ;;  %v251_v9 = vsub.f32 %v247_v50, %v250_v8 }
 0x33b   :  { %v252_v10 = vmul.f32 1.442695, %v251_v9 }
 0x33c   :  { %v294_v11 = vpop.xlane.xlu0 %293 }
 0x33d   :  { %546 = vpow2.f32 %v252_v10  ;;  %v295_v12 = vsub.f32 %v291_v55, %v294_v11 }
 0x33f   :  { %v296_v13 = vmul.f32 1.442695, %v295_v12 }
 0x340   :  { %v333_v14 = vpop.xlane.xlu0 %332 }
 0x341   :  { %548 = vpow2.f32 %v296_v13  ;;  %v334_v15 = vsub.f32 %v330_v59, %v333_v14 }
 0x342   :  { %v745_v16 = vpop.eup %542 }
 0x343   :  { %v335_v17 = vmul.f32 1.442695, %v334_v15  ;;  %v163_v19 = vsel %vm156_vm8, %v745_v16, 0.0 }
 0x344   :  { %164 = vadd.xlane.f32.xlu1 %v163_v19  ;;  %v368_v20 = vpop.xlane.xlu0 %367 }
 0x345   :  { %550 = vpow2.f32 %v335_v17  ;;  %v369_v21 = vsub.f32 %v365_v62, %v368_v20  ;;  %v509_v62 = vld [vmem:[%s780_s4] ss:$0 sm:$0xff] }
 0x346   :  { %v545_v22 = vpop.eup %544 }
 0x347   :  { %v370_v23 = vmul.f32 1.442695, %v369_v21  ;;  %v210_v24 = vsel %vm156_vm8, %v545_v22, 0.0 }
 0x348   :  { %211 = vadd.xlane.f32.xlu1 %v210_v24 }
 0x349   :  { %552 = vpow2.f32 %v370_v23 }
 0x34a   :  { %v547_v25 = vpop.eup %546 }
 0x34b   :  { %v254_v26 = vsel %vm156_vm8, %v547_v25, 0.0 }
 0x34c   :  { %255 = vadd.xlane.f32.xlu1 %v254_v26 }
 0x34e   :  { %v549_v27 = vpop.eup %548 }
 0x34f   :  { %v298_v28 = vsel %vm156_vm8, %v549_v27, 0.0 }
 0x350   :  { %299 = vadd.xlane.f32.xlu1 %v298_v28 }
 0x352   :  { %v551_v29 = vpop.eup %550 }
 0x353   :  { %v337_v30 = vsel %vm151_vm6, %v551_v29, 0.0 }
 0x354   :  { %338 = vadd.xlane.f32.xlu1 %v337_v30 }
 0x356   :  { %v553_v31 = vpop.eup %552 }
 0x357   :  { %v372_v32 = vsel %vm151_vm6, %v553_v31, 0.0 }
 0x358   :  { %373 = vadd.xlane.f32.xlu1 %v372_v32 }
 0x3cd   :  { %v165_v33 = vpop.xlane.xlu1 %164 }
 0x3d1   :  { %v212_v34 = vpop.xlane.xlu1 %211 }
 0x3d2   :  { %554 = vrcp.f32 %v212_v34 }
 0x3d5   :  { %v256_v35 = vpop.xlane.xlu1 %255 }
 0x3d6   :  { %556 = vrcp.f32 %v256_v35 }
 0x3d9   :  { %v300_v18 = vpop.xlane.xlu1 %299 }
 0x3da   :  { %558 = vrcp.f32 %v300_v18 }
 0x3dd   :  { %v339_v36 = vpop.xlane.xlu1 %338 }
 0x3de   :  { %560 = vrcp.f32 %v339_v36 }
 0x3df   :  { %v555_v37 = vpop.eup %554 }
 0x3e0   :  { %v214_v38 = vmul.f32 %v555_v37, %v545_v22 }
 0x3e1   :  { %v374_v40 = vpop.xlane.xlu1 %373 }
 0x3e2   :  { %562 = vrcp.f32 %v374_v40  ;;  %378 = vrot.lane.b32.xlu0 %v214_v38, %s598_s27 }
 0x3e3   :  { %v557_v42 = vpop.eup %556  ;;  %564 = vrcp.f32 %v165_v33 }
 0x3e4   :  { %v258_v43 = vmul.f32 %v557_v42, %v547_v25 }
 0x3e6   :  { %382 = vrot.lane.b32.xlu1 %v258_v43, %s600_s30 }
 0x3e7   :  { %v559_v45 = vpop.eup %558 }
 0x3e8   :  { %v302_v46 = vmul.f32 %v559_v45, %v549_v27 }
 0x3ea   :  { %386 = vrot.lane.b32.xlu1 %v302_v46, %s601_s6 }
 0x3eb   :  { %v561_v47 = vpop.eup %560 }
 0x3ec   :  { %v341_v48 = vmul.f32 %v561_v47, %v551_v29 }
 0x3ee   :  { %390 = vrot.lane.b32.xlu0 %v341_v48, %s602_s7 }
 0x3ef   :  { %v563_v49 = vpop.eup %562 }
 0x3f0   :  { %v376_v50 = vmul.f32 %v563_v49, %v553_v31  ;;  %v565_v52 = vpop.eup %564 }
 0x3f1   :  { %v167_v4 = vmul.f32 %v565_v52, %v745_v16 }
 0x3f2   :  { %394 = vrot.lane.b32.xlu1 %v376_v50, %s603_s8 }
 0x454   :  { %v379_v53 = vpop.permute.xlu0 %378 }
 0x455   :  { %v397_v55 = vsel %vm156_vm8, %v167_v4, %v379_v53 }
 0x458   :  { %v383_v51 = vpop.permute.xlu1 %382 }
 0x459   :  { %v399_v57 = vsel %vm398_vm11, %v397_v55, %v383_v51 }
 0x45c   :  { %v387_v54 = vpop.permute.xlu1 %386 }
 0x45d   :  { %v401_v58 = vsel %vm400_vm12, %v399_v57, %v387_v54 }
 0x460   :  { %v391_v56 = vpop.permute.xlu0 %390 }
 0x461   :  { %v403_v59 = vsel %vm402_vm13, %v401_v58, %v391_v56 }
 0x464   :  { %v395_v60 = vpop.permute.xlu1 %394 }
 0x465   :  { %v405_v61 = vsel %vm404_vm14, %v403_v59, %v395_v60 }
 0x466   :  { %523 = vmatmul.mubr.msk.f32.vlgmr.msra.gmra.mxu1 %vm314_vm4, %v405_v61 }
 0x526   :  { %v489_v63 = vpop.f32.mrf.mxu1 }
 0x527   :  { %v490_v0 = vadd.f32 %v509_v62, %v489_v63 }
 0x528   :  { %v524_v1 = vpop.f32.mrf.mxu1 }
 0x529   :  { %493 = vst.msk [vmem:[#allocation2] sm:$0xff] %vm44_vm0, %v490_v0 }
 0x52a   :  { %577 = shalt.err (!%p574_p4)
}
 0x52b   :  { %503 = dma.vmem_to_hbm [thread:$0]  %s501_s11, 128, %s781_s5, [#allocation3]  }
 0x52c   :  { %586 = dma.done.wait [#allocation3], 128  }
 0x52d   :  { %587 = vsyncadd [#allocation3], 4294967168 }
 0x52e   :  { %507 = vsyncpa [#allocation3], 1 }

</bundles_post_ra>
